<compile_context>
chip_gen: v6e
topology: v6e:2x2x1
jax: 0.10.0
libtpu: 0.0.40
codegen_flags: <defaults>
</compile_context>

<pallas_src>
import jax
import jax.numpy as jnp
from jax.experimental import pallas as pl
from jax.experimental.pallas import tpu as pltpu

_TARGET_TILE_BYTES = 2 * 1024 * 1024     # ~2 MiB per input tile (v7x-safe double-buffered)
_MAX_TILE_ROWS = 4096

# Irwin-Hall(4) over 8-bit uniforms: S4 in [0, 1020], E[S4] = 510,
# Var[S4] = 4 * (256^2 - 1) / 12 = 21845.
_S4_MEAN = 510.0
_S4_INV_STD = 1.0 / (21845.0 ** 0.5)


def _fmix32(x):
    """murmur3 finalizer: full-avalanche, bijective 32-bit mixer (uint32 in/out)."""
    x = x ^ (x >> jnp.uint32(16))
    x = x * jnp.uint32(0x85EBCA6B)
    x = x ^ (x >> jnp.uint32(13))
    x = x * jnp.uint32(0xC2B2AE35)
    x = x ^ (x >> jnp.uint32(16))
    return x


def _gaussian_dropout_kernel(seed_ref, alpha_ref, x_ref, o_ref):
    tile_r, cols = x_ref.shape
    pid = pl.program_id(0)

    # Per-tile seed (scalar-unit work only): golden-ratio scramble of the grid step.
    seed_u = seed_ref[0].astype(jnp.uint32)
    tile_seed = seed_u ^ (pid.astype(jnp.uint32) * jnp.uint32(0x9E3779B9))

    # eps = 1 + alpha * z,  z = (S4 - mean) * inv_std   =>   eps = a + b * S4
    alpha = alpha_ref[0]
    b_c = alpha * jnp.float32(_S4_INV_STD)
    a_c = jnp.float32(1.0) - jnp.float32(_S4_MEAN) * b_c

    # Unique 32-bit counter per element within the tile, xor-folded with tile_seed.
    row = jax.lax.broadcasted_iota(jnp.uint32, (tile_r, cols), 0)
    col = jax.lax.broadcasted_iota(jnp.uint32, (tile_r, cols), 1)
    ctr = (row * jnp.uint32(cols) + col) ^ tile_seed

    # One hash per element -> four 8-bit uniforms -> Irwin-Hall(4) ~ Gaussian.
    h = _fmix32(ctr)
    s4 = (
        (h & jnp.uint32(0xFF))
        + ((h >> jnp.uint32(8)) & jnp.uint32(0xFF))
        + ((h >> jnp.uint32(16)) & jnp.uint32(0xFF))
        + (h >> jnp.uint32(24))
    )
    s4f = s4.astype(jnp.int32).astype(jnp.float32)   # exact: values in [0, 1020]

    eps = a_c + b_c * s4f                            # e ~ N(1, alpha^2) (CLT approx)
    xv = x_ref[...].astype(jnp.float32)
    o_ref[...] = (xv * eps).astype(o_ref.dtype)


def gaussian_dropout(x, alpha=1.0, seed=0, training=True):
    """x: (N, C, H, W). Returns x * e with e ~ N(1, alpha^2) elementwise."""
    if not training:
        return x

    orig_shape = x.shape
    total = int(x.size)

    # Lane-dense flatten: widest L in {1024, 512, 256, 128} dividing the total,
    # else fall back to the contiguous trailing axes.
    cols = None
    for cand in (1024, 512, 256, 128):
        if total % cand == 0:
            cols = cand
            break
    if cols is None:
        if len(orig_shape) >= 2:
            cols = int(orig_shape[-1] * orig_shape[-2])
        else:
            cols = total
    rows = total // cols
    x2 = x.reshape(rows, cols)

    # Row tile sized to ~2 MiB (multiple of 8 rows), capped.
    bytes_per_row = cols * x2.dtype.itemsize
    tile_r = (_TARGET_TILE_BYTES // bytes_per_row) // 8 * 8
    tile_r = int(max(8, min(_MAX_TILE_ROWS, tile_r)))
    if rows <= tile_r:
        tile_r = rows  # single full-extent block is always a legal block shape
    grid = (pl.cdiv(rows, tile_r),)

    seed_arr = jnp.asarray([seed], dtype=jnp.int32)
    alpha_arr = jnp.asarray([alpha], dtype=jnp.float32)

    out2 = pl.pallas_call(
        _gaussian_dropout_kernel,
        out_shape=jax.ShapeDtypeStruct((rows, cols), x2.dtype),
        grid=grid,
        in_specs=[
            pl.BlockSpec(memory_space=pltpu.MemorySpace.SMEM),   # seed scalar
            pl.BlockSpec(memory_space=pltpu.MemorySpace.SMEM),   # alpha scalar
            pl.BlockSpec((tile_r, cols), lambda i: (i, 0)),      # x tile
        ],
        out_specs=pl.BlockSpec((tile_r, cols), lambda i: (i, 0)),
        compiler_params=pltpu.CompilerParams(
            dimension_semantics=("parallel",),
            vmem_limit_bytes=32 * 1024 * 1024,
        ),
    )(seed_arr, alpha_arr, x2)

    return out2.reshape(orig_shape)


if __name__ == "__main__":
    key = jax.random.PRNGKey(0)
    x = jax.random.normal(key, (2, 4, 16, 16), dtype=jnp.float32)

    alpha = 1.0
    y = gaussian_dropout(x, alpha=alpha, seed=0, training=True)
    y = jax.block_until_ready(y)

    assert y.shape == x.shape and y.dtype == x.dtype

    # Determinism: same seed -> identical noise.
    y2 = jax.block_until_ready(gaussian_dropout(x, alpha=alpha, seed=0, training=True))
    assert bool(jnp.all(y == y2))

    # Different seed -> different noise.
    y3 = jax.block_until_ready(gaussian_dropout(x, alpha=alpha, seed=1, training=True))
    assert not bool(jnp.all(y == y3))

    # Loose statistical sanity on eps = y / x  (E[eps] = 1, Var[eps] = alpha^2).
    mask = jnp.abs(x) > 1e-3
    safe_x = jnp.where(mask, x, 1.0)
    eps = jnp.where(mask, y / safe_x, 1.0)
    n_valid = jnp.sum(mask)
    mean_eps = jnp.sum(jnp.where(mask, eps, 0.0)) / n_valid
    var_eps = jnp.sum(jnp.where(mask, (eps - mean_eps) ** 2, 0.0)) / n_valid
    assert abs(float(mean_eps) - 1.0) < 0.2, float(mean_eps)
    assert 0.6 < float(var_eps) < 1.5, float(var_eps)

    # Eval mode is identity.
    y_eval = gaussian_dropout(x, alpha=alpha, seed=0, training=False)
    assert bool(jnp.all(y_eval == x))

    # TODO(synk): torch uses the global RNG (torch.randn); here noise is driven by an
    # explicit integer seed + counter-based hash PRNG, and the Gaussian is a CLT
    # (sum-of-4-uniforms) approximation, so it matches in distribution, not bitwise.
    print("KERNEL_OK")
</pallas_src>

<mosaic_0001>
module attributes {stable_mosaic.version = 11 : i64} {
  func.func @_gaussian_dropout_kernel(%arg0: i32, %arg1: memref<1xi32, #tpu.memory_space<smem>>, %arg2: memref<1xf32, #tpu.memory_space<smem>>, %arg3: memref<2x1024xf32, #tpu.memory_space<vmem>>, %arg4: memref<2x1024xf32, #tpu.memory_space<vmem>>) attributes {dimension_semantics = [#tpu.dimension_semantics<parallel>], iteration_bounds = array<i64: 1>, scalar_prefetch = 0 : i64, scratch_operands = 0 : i64, tpu.core_type = #tpu.core_type<tc>, window_params = [{transform_indices = @transform_0, window_bounds = array<i64: 1>}, {transform_indices = @transform_1, window_bounds = array<i64: 1>}, {transform_indices = @transform_2, window_bounds = array<i64: 2, 1024>}, {transform_indices = @transform_3, window_bounds = array<i64: 2, 1024>}]} {
    %c0 = arith.constant 0 : index
    %0 = memref.load %arg1[%c0] : memref<1xi32, #tpu.memory_space<smem>>
    %c-1640531527_i32 = arith.constant -1640531527 : i32
    %1 = arith.muli %arg0, %c-1640531527_i32 : i32
    %2 = arith.xori %0, %1 : i32
    %c0_0 = arith.constant 0 : index
    %3 = memref.load %arg2[%c0_0] : memref<1xf32, #tpu.memory_space<smem>>
    %cst = arith.constant 0.00676587503 : f32
    %4 = arith.mulf %3, %cst : f32
    %cst_1 = arith.constant 5.100000e+02 : f32
    %5 = arith.mulf %cst_1, %4 : f32
    %cst_2 = arith.constant 1.000000e+00 : f32
    %6 = arith.subf %cst_2, %5 : f32
    %7 = tpu.iota {dimensions = array<i32: 0>} : vector<2x1024xi32>
    %8 = tpu.iota {dimensions = array<i32: 1>} : vector<2x1024xi32>
    %c1024_i32 = arith.constant 1024 : i32
    %9 = vector.broadcast %c1024_i32 : i32 to vector<2x1024xi32>
    %10 = arith.muli %7, %9 : vector<2x1024xi32>
    %11 = arith.addi %10, %8 : vector<2x1024xi32>
    %12 = vector.broadcast %2 : i32 to vector<2x1024xi32>
    %13 = arith.xori %11, %12 : vector<2x1024xi32>
    %c16_i32 = arith.constant 16 : i32
    %14 = vector.broadcast %c16_i32 : i32 to vector<2x1024xi32>
    %15 = arith.shrui %13, %14 : vector<2x1024xi32>
    %16 = arith.xori %13, %15 : vector<2x1024xi32>
    %c-2048144789_i32 = arith.constant -2048144789 : i32
    %17 = vector.broadcast %c-2048144789_i32 : i32 to vector<2x1024xi32>
    %18 = arith.muli %16, %17 : vector<2x1024xi32>
    %c13_i32 = arith.constant 13 : i32
    %19 = vector.broadcast %c13_i32 : i32 to vector<2x1024xi32>
    %20 = arith.shrui %18, %19 : vector<2x1024xi32>
    %21 = arith.xori %18, %20 : vector<2x1024xi32>
    %c-1028477387_i32 = arith.constant -1028477387 : i32
    %22 = vector.broadcast %c-1028477387_i32 : i32 to vector<2x1024xi32>
    %23 = arith.muli %21, %22 : vector<2x1024xi32>
    %c16_i32_3 = arith.constant 16 : i32
    %24 = vector.broadcast %c16_i32_3 : i32 to vector<2x1024xi32>
    %25 = arith.shrui %23, %24 : vector<2x1024xi32>
    %26 = arith.xori %23, %25 : vector<2x1024xi32>
    %c255_i32 = arith.constant 255 : i32
    %27 = vector.broadcast %c255_i32 : i32 to vector<2x1024xi32>
    %28 = arith.andi %26, %27 : vector<2x1024xi32>
    %c8_i32 = arith.constant 8 : i32
    %29 = vector.broadcast %c8_i32 : i32 to vector<2x1024xi32>
    %30 = arith.shrui %26, %29 : vector<2x1024xi32>
    %c255_i32_4 = arith.constant 255 : i32
    %31 = vector.broadcast %c255_i32_4 : i32 to vector<2x1024xi32>
    %32 = arith.andi %30, %31 : vector<2x1024xi32>
    %33 = arith.addi %28, %32 : vector<2x1024xi32>
    %c16_i32_5 = arith.constant 16 : i32
    %34 = vector.broadcast %c16_i32_5 : i32 to vector<2x1024xi32>
    %35 = arith.shrui %26, %34 : vector<2x1024xi32>
    %c255_i32_6 = arith.constant 255 : i32
    %36 = vector.broadcast %c255_i32_6 : i32 to vector<2x1024xi32>
    %37 = arith.andi %35, %36 : vector<2x1024xi32>
    %38 = arith.addi %33, %37 : vector<2x1024xi32>
    %c24_i32 = arith.constant 24 : i32
    %39 = vector.broadcast %c24_i32 : i32 to vector<2x1024xi32>
    %40 = arith.shrui %26, %39 : vector<2x1024xi32>
    %41 = arith.addi %38, %40 : vector<2x1024xi32>
    %42 = arith.sitofp %41 : vector<2x1024xi32> to vector<2x1024xf32>
    %43 = vector.broadcast %4 : f32 to vector<2x1024xf32>
    %44 = arith.mulf %43, %42 : vector<2x1024xf32>
    %45 = vector.broadcast %6 : f32 to vector<2x1024xf32>
    %46 = arith.addf %45, %44 : vector<2x1024xf32>
    %c0_7 = arith.constant 0 : index
    %c0_8 = arith.constant 0 : index
    %47 = vector.load %arg3[%c0_7, %c0_8] : memref<2x1024xf32, #tpu.memory_space<vmem>>, vector<2x1024xf32>
    %48 = arith.mulf %47, %46 : vector<2x1024xf32>
    %c0_9 = arith.constant 0 : index
    %c0_10 = arith.constant 0 : index
    %49 = vector.load %arg4[%c0_9, %c0_10] : memref<2x1024xf32, #tpu.memory_space<vmem>>, vector<2x1024xf32>
    tpu.vector_store %arg4[%c0_9, %c0_10], %48 {strides = array<i32>} : memref<2x1024xf32, #tpu.memory_space<vmem>>, vector<2x1024xf32>,
    return
  }
  func.func @transform_0(%arg0: i32) -> i32 {
    %c0_i32 = arith.constant 0 : i32
    %c0_i32_0 = arith.constant 0 : i32
    return %c0_i32 : i32
  }
  func.func @transform_1(%arg0: i32) -> i32 {
    %c0_i32 = arith.constant 0 : i32
    %c0_i32_0 = arith.constant 0 : i32
    return %c0_i32 : i32
  }
  func.func @transform_2(%arg0: i32) -> (i32, i32) {
    %c0_i32 = arith.constant 0 : i32
    %c0_i32_0 = arith.constant 0 : i32
    return %arg0, %c0_i32 : i32, i32
  }
  func.func @transform_3(%arg0: i32) -> (i32, i32) {
    %c0_i32 = arith.constant 0 : i32
    %c0_i32_0 = arith.constant 0 : i32
    return %arg0, %c0_i32 : i32, i32
  }
}

</mosaic_0001>

<bundles_post_ra>
// kernel: tpu_custom_call.1
= control target key start
LH: loop header
LB: loop body
LE: loop exit
PB: predicated region body
PF: predicated region fallthrough
CT: control target
= control target key end

     0   :  { %10 = vsyncpa [#allocation5], 0  ;;  %s403_s0 = inlined_call_operand.<no memory space> [shape: s32[1], index: 0, kind: input, shape index: {}]   ;;  %s404_s1 = inlined_call_operand.<no memory space> [shape: f32[1], index: 1, kind: input, shape index: {}]   ;;  %s405_s2 = inlined_call_operand.hbm [shape: f32[2,1024], index: 2, kind: input, shape index: {}]   ;;  %s406_s3 = inlined_call_operand.hbm [shape: f32[2,1024], index: 3, kind: output, shape index: {}]  }
   0x1   :  { %11 = vsyncpa [#allocation6], 0  ;;  %s339_s12 = smov [#allocation4]  }
   0x2   :  { %s22_s13 = sshll.u32 %s339_s12, 4  ;;  %s23_s13 = int_to_ptr.vmem [resolvable:$true] %s22_s13 }
   0x3   :  { %s303_s14 = scalar_lea.vmem %s23_s13, 256  ;;  %p308_p1 = scmp.lt.s32.totalorder %s23_s13, %s23_s13 }
   0x4   :  { %p304_p0 = scmp.ne.s32.totalorder %s23_s13, %s303_s14  ;;  %p309_p2 = scmp.lt.s32.totalorder %s303_s14, %s303_s14 }
   0x6   :  { %p310_p3 = por %p309_p2, %p308_p1 }
   0x8   :  { %p311_p4 = pnand %p310_p3, %p304_p0 }
   0xa   :  { %314 = shalt.err (!%p311_p4)
}
   0xb   :  { %25 = dma.hbm_to_vmem [thread:$0]  %s405_s2, 256, %s23_s13, [#allocation5]  }
   0xc   :  { %335 = dma.done.wait [#allocation5], 256  }
   0xd   :  { %336 = vsyncadd [#allocation5], 4294967040  ;;  %v36_v0 = vlaneseq  ;;  %s33_s19 = smul.f32 0.006765875, %s404_s1  ;;  %v56_v3 = vstv %s403_s0  ;;  %v340_v4 = vmov 1983009808  }
   0xe   :  { %v240_v5 = vunpack.c.l.s4 %v340_v4  ;;  %s341_s1 = smov [#allocation7]  }
   0xf   :  { %v37_v1 = vshrl.u32 %v36_v0, 7  ;;  %v39_v2 = vand.u32 127, %v36_v0  ;;  %v371_v10 = vstv %s33_s19  ;;  %s373_s2 = smul.f32 510.0, %s33_s19  ;;  %s283_s22 = sshll.u32 %s341_s1, 4  ;;  %s284_s22 = int_to_ptr.vmem [resolvable:$true] %s283_s22 }
  0x10   :  { %v241_v18 = vunpack.c.0.s8 %v240_v5  ;;  %s315_s23 = scalar_lea.vmem %s284_s22, 256  ;;  %p320_p6 = scmp.lt.s32.totalorder %s284_s22, %s284_s22 }
  0x11   :  { %v40_v6 = vadd.s32 128, %v39_v2  ;;  %v41_v7 = vadd.s32 256, %v39_v2  ;;  %v42_v8 = vadd.s32 384, %v39_v2  ;;  %v47_v9 = vmul.u32 1024, %v37_v1  ;;  %s35_s0 = ssub.f32 1.0, %s373_s2  ;;  %p316_p5 = scmp.ne.s32.totalorder %s284_s22, %s315_s23 }
  0x12   :  { %v43_v11 = vadd.s32 512, %v39_v2  ;;  %v44_v12 = vadd.s32 640, %v39_v2  ;;  %v45_v13 = vadd.s32 768, %v39_v2  ;;  %v46_v19 = vadd.s32 896, %v39_v2  ;;  %p321_p7 = scmp.lt.s32.totalorder %s315_s23, %s315_s23 }
  0x13   :  { %v48_v14 = vadd.s32 %v47_v9, %v39_v2  ;;  %v49_v15 = vadd.s32 %v47_v9, %v40_v6  ;;  %v50_v16 = vadd.s32 %v47_v9, %v41_v7  ;;  %v51_v17 = vadd.s32 %v47_v9, %v42_v8 }
  0x14   :  { %v52_v20 = vadd.s32 %v47_v9, %v43_v11  ;;  %v53_v21 = vadd.s32 %v47_v9, %v44_v12  ;;  %v54_v26 = vadd.s32 %v47_v9, %v45_v13  ;;  %v55_v27 = vadd.s32 %v47_v9, %v46_v19  ;;  %p322_p8 = por %p321_p7, %p320_p6 }
  0x15   :  { %v57_v22 = vxor.u32 %v56_v3, %v48_v14  ;;  %v58_v23 = vxor.u32 %v56_v3, %v49_v15  ;;  %v59_v24 = vxor.u32 %v56_v3, %v50_v16  ;;  %v60_v25 = vxor.u32 %v56_v3, %v51_v17 }
  0x16   :  { %v61_v28 = vxor.u32 %v56_v3, %v52_v20  ;;  %v62_v29 = vxor.u32 %v56_v3, %v53_v21  ;;  %v63_v34 = vxor.u32 %v56_v3, %v54_v26  ;;  %v64_v35 = vxor.u32 %v56_v3, %v55_v27  ;;  %p323_p9 = pnand %p322_p8, %p316_p5 }
  0x17   :  { %v65_v30 = vshrl.u32 %v57_v22, 16  ;;  %v66_v31 = vshrl.u32 %v58_v23, 16  ;;  %v67_v32 = vshrl.u32 %v59_v24, 16  ;;  %v68_v33 = vshrl.u32 %v60_v25, 16 }
  0x18   :  { %v69_v36 = vshrl.u32 %v61_v28, 16  ;;  %v70_v37 = vshrl.u32 %v62_v29, 16  ;;  %v71_v42 = vshrl.u32 %v63_v34, 16  ;;  %v72_v43 = vshrl.u32 %v64_v35, 16 }
  0x19   :  { %v73_v38 = vxor.u32 %v65_v30, %v57_v22  ;;  %v74_v39 = vxor.u32 %v66_v31, %v58_v23  ;;  %v75_v40 = vxor.u32 %v67_v32, %v59_v24  ;;  %v76_v41 = vxor.u32 %v68_v33, %v60_v25 }
  0x1a   :  { %v77_v44 = vxor.u32 %v69_v36, %v61_v28  ;;  %v78_v45 = vxor.u32 %v70_v37, %v62_v29  ;;  %v376_v48 = vstv %s35_s0  ;;  %v378_v49 = vsub.s32 %v241_v18, %v37_v1 }
  0x1b   :  { %v81_v46 = vmul.u32 2246822507, %v73_v38  ;;  %v82_v47 = vmul.u32 2246822507, %v74_v39  ;;  %v79_v52 = vxor.u32 %v71_v42, %v63_v34  ;;  %v80_v53 = vxor.u32 %v72_v43, %v64_v35 }
  0x1c   :  { %v83_v50 = vmul.u32 2246822507, %v75_v40  ;;  %v84_v51 = vmul.u32 2246822507, %v76_v41 }
  0x1d   :  { %v89_v54 = vshrl.u32 %v81_v46, 13  ;;  %v90_v55 = vshrl.u32 %v82_v47, 13  ;;  %v85_v56 = vmul.u32 2246822507, %v77_v44  ;;  %v86_v57 = vmul.u32 2246822507, %v78_v45 }
  0x1e   :  { %v91_v58 = vshrl.u32 %v83_v50, 13  ;;  %v92_v59 = vshrl.u32 %v84_v51, 13  ;;  %v87_v60 = vmul.u32 2246822507, %v79_v52  ;;  %v88_v61 = vmul.u32 2246822507, %v80_v53 }
  0x1f   :  { %v97_v62 = vxor.u32 %v89_v54, %v81_v46  ;;  %v98_v63 = vxor.u32 %v90_v55, %v82_v47  ;;  %v93_v0 = vshrl.u32 %v85_v56, 13  ;;  %v94_v2 = vshrl.u32 %v86_v57, 13 }
  0x20   :  { %v99_v3 = vxor.u32 %v91_v58, %v83_v50  ;;  %v100_v4 = vxor.u32 %v92_v59, %v84_v51  ;;  %v95_v1 = vshrl.u32 %v87_v60, 13  ;;  %v96_v5 = vshrl.u32 %v88_v61, 13 }
  0x21   :  { %v105_v6 = vmul.u32 3266489909, %v97_v62  ;;  %v106_v7 = vmul.u32 3266489909, %v98_v63  ;;  %v101_v8 = vxor.u32 %v93_v0, %v85_v56  ;;  %v102_v9 = vxor.u32 %v94_v2, %v86_v57 }
  0x22   :  { %v107_v11 = vmul.u32 3266489909, %v99_v3  ;;  %v108_v12 = vmul.u32 3266489909, %v100_v4  ;;  %v103_v13 = vxor.u32 %v95_v1, %v87_v60  ;;  %v104_v14 = vxor.u32 %v96_v5, %v88_v61 }
  0x23   :  { %v113_v15 = vshrl.u32 %v105_v6, 16  ;;  %v114_v16 = vshrl.u32 %v106_v7, 16  ;;  %v109_v17 = vmul.u32 3266489909, %v101_v8  ;;  %v110_v18 = vmul.u32 3266489909, %v102_v9 }
  0x24   :  { %v115_v19 = vshrl.u32 %v107_v11, 16  ;;  %v116_v20 = vshrl.u32 %v108_v12, 16  ;;  %v111_v21 = vmul.u32 3266489909, %v103_v13  ;;  %v112_v22 = vmul.u32 3266489909, %v104_v14 }
  0x25   :  { %v121_v23 = vxor.u32 %v113_v15, %v105_v6  ;;  %v122_v24 = vxor.u32 %v114_v16, %v106_v7  ;;  %v117_v25 = vshrl.u32 %v109_v17, 16  ;;  %v118_v26 = vshrl.u32 %v110_v18, 16 }
  0x26   :  { %v123_v27 = vxor.u32 %v115_v19, %v107_v11  ;;  %v124_v28 = vxor.u32 %v116_v20, %v108_v12  ;;  %v119_v29 = vshrl.u32 %v111_v21, 16  ;;  %v120_v30 = vshrl.u32 %v112_v22, 16 }
  0x27   :  { %v129_v31 = vand.u32 255, %v121_v23  ;;  %v130_v32 = vand.u32 255, %v122_v24  ;;  %v137_v33 = vshrl.u32 %v121_v23, 8  ;;  %v138_v34 = vshrl.u32 %v122_v24, 8 }
  0x28   :  { %v131_v35 = vand.u32 255, %v123_v27  ;;  %v132_v36 = vand.u32 255, %v124_v28  ;;  %v139_v37 = vshrl.u32 %v123_v27, 8  ;;  %v140_v38 = vshrl.u32 %v124_v28, 8 }
  0x29   :  { %v145_v39 = vand.u32 255, %v137_v33  ;;  %v146_v40 = vand.u32 255, %v138_v34  ;;  %v161_v41 = vshrl.u32 %v121_v23, 16  ;;  %v162_v42 = vshrl.u32 %v122_v24, 16 }
  0x2a   :  { %v147_v43 = vand.u32 255, %v139_v37  ;;  %v148_v44 = vand.u32 255, %v140_v38  ;;  %v163_v45 = vshrl.u32 %v123_v27, 16  ;;  %v164_v46 = vshrl.u32 %v124_v28, 16 }
  0x2b   :  { %v153_v47 = vadd.s32 %v145_v39, %v129_v31  ;;  %v154_v50 = vadd.s32 %v146_v40, %v130_v32  ;;  %v169_v51 = vand.u32 255, %v161_v41  ;;  %v170_v52 = vand.u32 255, %v162_v42 }
  0x2c   :  { %v155_v53 = vadd.s32 %v147_v43, %v131_v35  ;;  %v156_v54 = vadd.s32 %v148_v44, %v132_v36  ;;  %v171_v55 = vand.u32 255, %v163_v45  ;;  %v172_v56 = vand.u32 255, %v164_v46 }
  0x2d   :  { %v177_v57 = vadd.s32 %v169_v51, %v153_v47  ;;  %v178_v58 = vadd.s32 %v170_v52, %v154_v50  ;;  %v185_v59 = vshrl.u32 %v121_v23, 24  ;;  %v186_v60 = vshrl.u32 %v122_v24, 24  ;;  %v227_v52 = vld [vmem:[#allocation4] sm:$0xff] }
  0x2e   :  { %v179_v61 = vadd.s32 %v171_v55, %v155_v53  ;;  %v180_v62 = vadd.s32 %v172_v56, %v156_v54  ;;  %v187_v63 = vshrl.u32 %v123_v27, 24  ;;  %v188_v0 = vshrl.u32 %v124_v28, 24 }
  0x2f   :  { %v193_v2 = vadd.s32 %v185_v59, %v177_v57  ;;  %v194_v3 = vadd.s32 %v186_v60, %v178_v58  ;;  %v125_v4 = vxor.u32 %v117_v25, %v109_v17  ;;  %v126_v1 = vxor.u32 %v118_v26, %v110_v18 }
  0x30   :  { %v195_v5 = vadd.s32 %v187_v63, %v179_v61  ;;  %v196_v6 = vadd.s32 %v188_v0, %v180_v62  ;;  %v127_v7 = vxor.u32 %v119_v29, %v111_v21  ;;  %v128_v8 = vxor.u32 %v120_v30, %v112_v22 }
  0x31   :  { %v201_v9 = vcvt.s32.f32 %v193_v2  ;;  %v202_v11 = vcvt.s32.f32 %v194_v3  ;;  %v133_v12 = vand.u32 255, %v125_v4  ;;  %v134_v13 = vand.u32 255, %v126_v1 }
  0x32   :  { %v203_v14 = vcvt.s32.f32 %v195_v5  ;;  %v204_v15 = vcvt.s32.f32 %v196_v6  ;;  %v135_v16 = vand.u32 255, %v127_v7  ;;  %v136_v19 = vand.u32 255, %v128_v8 }
  0x33   :  { %v210_v20 = vmul.f32 %v371_v10, %v201_v9  ;;  %v211_v23 = vmul.f32 %v371_v10, %v202_v11  ;;  %v141_v24 = vshrl.u32 %v125_v4, 8  ;;  %v142_v27 = vshrl.u32 %v126_v1, 8 }
  0x34   :  { %v212_v17 = vmul.f32 %v371_v10, %v203_v14  ;;  %v213_v18 = vmul.f32 %v371_v10, %v204_v15  ;;  %v143_v21 = vshrl.u32 %v127_v7, 8  ;;  %v144_v22 = vshrl.u32 %v128_v8, 8 }
  0x35   :  { %v219_v25 = vadd.f32 %v376_v48, %v210_v20  ;;  %v220_v26 = vadd.f32 %v376_v48, %v211_v23  ;;  %v149_v28 = vand.u32 255, %v141_v24  ;;  %v150_v29 = vand.u32 255, %v142_v27  ;;  %v228_v24 = vld [vmem:[#allocation4 + $0x8] sm:$0xff] }
  0x36   :  { %v221_v30 = vadd.f32 %v376_v48, %v212_v17  ;;  %v222_v31 = vadd.f32 %v376_v48, %v213_v18  ;;  %v151_v32 = vand.u32 255, %v143_v21  ;;  %v152_v33 = vand.u32 255, %v144_v22 }
  0x37   :  { %v237_v34 = vcombine.low %v219_v25, %v220_v26  ;;  %v157_v35 = vadd.s32 %v149_v28, %v133_v12  ;;  %v158_v36 = vadd.s32 %v150_v29, %v134_v13  ;;  %v165_v37 = vshrl.u32 %v125_v4, 16 }
  0x38   :  { %v238_v38 = vcombine.low %v221_v30, %v222_v31  ;;  %v159_v39 = vadd.s32 %v151_v32, %v135_v16  ;;  %v160_v40 = vadd.s32 %v152_v33, %v136_v19  ;;  %v166_v41 = vshrl.u32 %v126_v1, 16 }
  0x39   :  { %v245_v42 = vrot.slane %v237_v34, %v378_v49  ;;  %v167_v43 = vshrl.u32 %v127_v7, 16  ;;  %v168_v44 = vshrl.u32 %v128_v8, 16  ;;  %v173_v45 = vand.u32 255, %v165_v37 }
  0x3a   :  { %v252_v46 = vrot.slane %v238_v38, %v378_v49  ;;  %v174_v47 = vand.u32 255, %v166_v41  ;;  %v189_v50 = vshrl.u32 %v125_v4, 24  ;;  %v190_v51 = vshrl.u32 %v126_v1, 24 }
  0x3b   :  { %v175_v53 = vand.u32 255, %v167_v43  ;;  %v176_v54 = vand.u32 255, %v168_v44  ;;  %v181_v55 = vadd.s32 %v173_v45, %v157_v35  ;;  %v191_v56 = vshrl.u32 %v127_v7, 24 }
  0x3c   :  { %v253_v57 = vcombine.low %v245_v42, %v252_v46  ;;  %v182_v58 = vadd.s32 %v174_v47, %v158_v36  ;;  %v192_v59 = vshrl.u32 %v128_v8, 24 }
  0x3d   :  { %v183_v60 = vadd.s32 %v175_v53, %v159_v39  ;;  %v184_v61 = vadd.s32 %v176_v54, %v160_v40  ;;  %v197_v62 = vadd.s32 %v189_v50, %v181_v55 }
  0x3e   :  { %v273_v63 = vmul.f32 %v253_v57, %v227_v52  ;;  %v198_v0 = vadd.s32 %v190_v51, %v182_v58 }
  0x3f   :  { %v199_v2 = vadd.s32 %v191_v56, %v183_v60  ;;  %v200_v3 = vadd.s32 %v192_v59, %v184_v61  ;;  %v205_v5 = vcvt.s32.f32 %v197_v62 }
  0x40   :  { %275 = vst [vmem:[#allocation7] sm:$0xff] %v273_v63  ;;  %v206_v6 = vcvt.s32.f32 %v198_v0 }
  0x41   :  { %v207_v4 = vcvt.s32.f32 %v199_v2  ;;  %v208_v1 = vcvt.s32.f32 %v200_v3  ;;  %v214_v9 = vmul.f32 %v371_v10, %v205_v5 }
  0x42   :  { %v215_v11 = vmul.f32 %v371_v10, %v206_v6 }
  0x43   :  { %v216_v7 = vmul.f32 %v371_v10, %v207_v4  ;;  %v217_v8 = vmul.f32 %v371_v10, %v208_v1  ;;  %v223_v12 = vadd.f32 %v376_v48, %v214_v9 }
  0x44   :  { %v224_v13 = vadd.f32 %v376_v48, %v215_v11 }
  0x45   :  { %v225_v14 = vadd.f32 %v376_v48, %v216_v7  ;;  %v226_v15 = vadd.f32 %v376_v48, %v217_v8 }
  0x46   :  { %v254_v16 = vcombine.low %v223_v12, %v224_v13 }
  0x47   :  { %v255_v19 = vcombine.low %v225_v14, %v226_v15 }
  0x48   :  { %v262_v20 = vrot.slane %v254_v16, %v378_v49 }
  0x49   :  { %v269_v23 = vrot.slane %v255_v19, %v378_v49 }
  0x4b   :  { %v270_v27 = vcombine.low %v262_v20, %v269_v23 }
  0x4d   :  { %v274_v17 = vmul.f32 %v270_v27, %v228_v24 }
  0x4f   :  { %276 = vst [vmem:[#allocation7 + $0x8] sm:$0xff] %v274_v17 }
  0x50   :  { %326 = shalt.err (!%p323_p9)
}
  0x51   :  { %286 = dma.vmem_to_hbm [thread:$0]  %s284_s22, 256, %s406_s3, [#allocation6]  }
  0x52   :  { %337 = dma.done.wait [#allocation6], 256  }
  0x53   :  { %338 = vsyncadd [#allocation6], 4294967040 }
  0x54   :  { %290 = vsyncpa [#allocation5], 1 }
  0x55   :  { %291 = vsyncpa [#allocation6], 1 }

</bundles_post_ra>
